<compile_context>
chip_gen: v6e
topology: v6e:2x2x1
jax: 0.10.0
libtpu: 0.0.40
codegen_flags: <defaults>
</compile_context>

<pallas_src>
import functools

import jax
import jax.numpy as jnp
from jax.experimental import pallas as pl
from jax.experimental.pallas import tpu as pltpu

EPS = 1e-5  # nn.BatchNorm1d default


def _round_up(x, m):
    return (x + m - 1) // m * m


# ---------------------------------------------------------------------------
# Kernel: out = relu(x + (relu(x @ W1' + b1') @ W2' + b2'))
# (BN already folded into W'/b'; dropout is identity in eval mode.)
# ---------------------------------------------------------------------------
def _residual_block_kernel(x_ref, w1_ref, b1_ref, w2_ref, b2_ref, o_ref):
    x_bf = x_ref[...]                                   # (tm, Cp) bf16
    x_f32 = x_bf.astype(jnp.float32)

    # Linear 1 (+ folded BN1) -> ReLU.  bf16 MXU operands, f32 accumulate.
    h = jnp.dot(x_bf, w1_ref[...], preferred_element_type=jnp.float32)
    h = jnp.maximum(h + b1_ref[...], 0.0)

    # Dropout: identity in eval mode.

    # Linear 2 (+ folded BN2).
    h = jnp.dot(h.astype(jnp.bfloat16), w2_ref[...],
                preferred_element_type=jnp.float32)
    h = h + b2_ref[...]

    # Residual add + ReLU in f32, cast only at the store.
    o_ref[...] = jnp.maximum(x_f32 + h, 0.0).astype(o_ref.dtype)


# ---------------------------------------------------------------------------
# Parameter prep (done ONCE, outside the jitted wrapper): fold eval-mode BN
# into the Linear layers, transpose to (in, out), pad channels to Cp, cast
# weights to bf16.
# ---------------------------------------------------------------------------
def _fold_bn_into_linear(w, b, gamma, beta, mean, var):
    # w: (out, in) PyTorch layout.  BN(x@W^T + b) == x @ (W*s)^T + ((b-mean)*s + beta)
    s = gamma * jax.lax.rsqrt(var + EPS)            # (out,)
    w_folded = (w * s[:, None]).T                   # -> (in, out), column-scaled
    b_folded = (b - mean) * s + beta
    return w_folded, b_folded


def prepare_params(params, channels, cp):
    w1f, b1f = _fold_bn_into_linear(params["w1"], params["b1"], params["g1"],
                                    params["be1"], params["m1"], params["v1"])
    w2f, b2f = _fold_bn_into_linear(params["w2"], params["b2"], params["g2"],
                                    params["be2"], params["m2"], params["v2"])
    pad_c = cp - channels

    def pad_w(w):
        return jnp.pad(w, ((0, pad_c), (0, pad_c))).astype(jnp.bfloat16)

    def pad_b(b):
        return jnp.pad(b, (0, pad_c)).reshape(1, cp).astype(jnp.float32)

    return pad_w(w1f), pad_b(b1f), pad_w(w2f), pad_b(b2f)


# ---------------------------------------------------------------------------
# Wrapper
# ---------------------------------------------------------------------------
@functools.partial(jax.jit, static_argnames=("tm",))
def residual_block(x, w1, b1, w2, b2, *, tm=256):
    """x: (N, C) float32.  w1/w2: (Cp, Cp) bf16 folded weights, b1/b2: (1, Cp) f32."""
    n, c = x.shape
    cp = w1.shape[0]

    # Row tile: prefer `tm` (multiple of 128), but shrink for small batches
    # (must stay a multiple of 8 for the sublane constraint).
    tm_eff = min(tm, _round_up(n, 8))
    n_pad = _round_up(n, tm_eff)

    # Zero-pad rows and channels; padded weight rows/cols and biases are zero,
    # so padded lanes stay exactly zero through the whole block and are sliced off.
    xp = jnp.pad(x, ((0, n_pad - n), (0, cp - c))).astype(jnp.bfloat16)

    grid = (n_pad // tm_eff,)
    row_spec = pl.BlockSpec((tm_eff, cp), lambda i: (i, 0))
    mat_spec = pl.BlockSpec((cp, cp), lambda i: (0, 0))   # grid-invariant: DMA'd once
    vec_spec = pl.BlockSpec((1, cp), lambda i: (0, 0))
    # NOTE: for very large C on v7x (64 MiB VMEM) the invariant weights could
    # additionally be single-buffered via pipeline_mode=pl.Buffered(1).

    grid_spec = pltpu.PrefetchScalarGridSpec(
        num_scalar_prefetch=0,
        grid=grid,
        in_specs=[row_spec, mat_spec, vec_spec, mat_spec, vec_spec],
        out_specs=pl.BlockSpec((tm_eff, cp), lambda i: (i, 0)),
    )

    # Advisory cost estimate: two (n_pad x cp x cp) matmuls.
    cost = pl.CostEstimate(
        flops=4 * n_pad * cp * cp,
        transcendentals=0,
        bytes_accessed=(n_pad * cp * 2            # x (bf16)
                        + n_pad * cp * 4          # out (f32)
                        + 2 * cp * cp * 2         # weights (bf16)
                        + 2 * cp * 4),            # biases (f32)
    )

    # Only raise the scoped VMEM limit if the (double-buffered) footprint needs it.
    vmem_bytes = (2 * 2 * cp * cp * 2             # two bf16 weights, double-buffered
                  + 2 * tm_eff * cp * 2 * 2       # x tiles (bf16), double-buffered
                  + 2 * tm_eff * cp * 4           # out tiles (f32), double-buffered
                  + 2 * 2 * cp * 4)               # biases
    vmem_limit = None
    if vmem_bytes > 16 * 1024 * 1024:
        vmem_limit = min(2 * vmem_bytes, 64 * 1024 * 1024)

    out = pl.pallas_call(
        _residual_block_kernel,
        out_shape=jax.ShapeDtypeStruct((n_pad, cp), jnp.float32),
        grid_spec=grid_spec,
        compiler_params=pltpu.CompilerParams(
            dimension_semantics=("parallel",),
            vmem_limit_bytes=vmem_limit,
        ),
        cost_estimate=cost,
    )(xp, w1, b1, w2, b2)

    return out[:n, :c].astype(x.dtype)


# ---------------------------------------------------------------------------
# Pure-JAX f32 reference of the eval-mode forward pass (unfolded BN).
# ---------------------------------------------------------------------------
def _reference(x, params):
    h = x @ params["w1"].T + params["b1"]
    h = (h - params["m1"]) / jnp.sqrt(params["v1"] + EPS) * params["g1"] + params["be1"]
    h = jnp.maximum(h, 0.0)
    h = h @ params["w2"].T + params["b2"]
    h = (h - params["m2"]) / jnp.sqrt(params["v2"] + EPS) * params["g2"] + params["be2"]
    return jnp.maximum(x + h, 0.0)


def _init_params(key, channels):
    ks = jax.random.split(key, 12)
    bound = 1.0 / jnp.sqrt(channels)
    u = lambda k, shape: jax.random.uniform(k, shape, jnp.float32, -bound, bound)
    return {
        # Linear 1
        "w1": u(ks[0], (channels, channels)),
        "b1": u(ks[1], (channels,)),
        # BatchNorm 1 (affine + running stats)
        "g1": 1.0 + 0.1 * jax.random.normal(ks[2], (channels,), jnp.float32),
        "be1": 0.1 * jax.random.normal(ks[3], (channels,), jnp.float32),
        "m1": 0.05 * jax.random.normal(ks[4], (channels,), jnp.float32),
        "v1": 1.0 + 0.1 * jax.random.uniform(ks[5], (channels,), jnp.float32),
        # Linear 2
        "w2": u(ks[6], (channels, channels)),
        "b2": u(ks[7], (channels,)),
        # BatchNorm 2
        "g2": 1.0 + 0.1 * jax.random.normal(ks[8], (channels,), jnp.float32),
        "be2": 0.1 * jax.random.normal(ks[9], (channels,), jnp.float32),
        "m2": 0.05 * jax.random.normal(ks[10], (channels,), jnp.float32),
        "v2": 1.0 + 0.1 * jax.random.uniform(ks[11], (channels,), jnp.float32),
    }


if __name__ == "__main__":
    key = jax.random.PRNGKey(0)
    batch, channels = 16, 32

    kx, kp = jax.random.split(key)
    x = jax.random.normal(kx, (batch, channels), jnp.float32)
    params = _init_params(kp, channels)

    cp = _round_up(channels, 128)                  # lane-dense channel padding
    w1p, b1p, w2p, b2p = prepare_params(params, channels, cp)

    out = residual_block(x, w1p, b1p, w2p, b2p, tm=256)
    out = jax.block_until_ready(out)

    ref = _reference(x, params)
    assert out.shape == (batch, channels)
    # bf16 MXU operands -> compare against the f32 reference with a bf16-level tolerance.
    assert jnp.allclose(out, ref, atol=5e-2, rtol=5e-2), "mismatch vs reference"

    print("KERNEL_OK")
</pallas_src>

<mosaic_0001>
module attributes {stable_mosaic.version = 11 : i64} {
  func.func @_residual_block_kernel(%arg0: i32, %arg1: memref<16x128xbf16, #tpu.memory_space<vmem>>, %arg2: memref<128x128xbf16, #tpu.memory_space<vmem>>, %arg3: memref<1x128xf32, #tpu.memory_space<vmem>>, %arg4: memref<128x128xbf16, #tpu.memory_space<vmem>>, %arg5: memref<1x128xf32, #tpu.memory_space<vmem>>, %arg6: memref<16x128xf32, #tpu.memory_space<vmem>>) attributes {dimension_semantics = [#tpu.dimension_semantics<parallel>], iteration_bounds = array<i64: 1>, scalar_prefetch = 0 : i64, scratch_operands = 0 : i64, tpu.core_type = #tpu.core_type<tc>, window_params = [{transform_indices = @transform_0, window_bounds = array<i64: 16, 128>}, {pipeline_mode = #tpu.pipeline_mode<synchronous>, transform_indices = @transform_1, window_bounds = array<i64: 128, 128>}, {pipeline_mode = #tpu.pipeline_mode<synchronous>, transform_indices = @transform_2, window_bounds = array<i64: 1, 128>}, {pipeline_mode = #tpu.pipeline_mode<synchronous>, transform_indices = @transform_3, window_bounds = array<i64: 128, 128>}, {pipeline_mode = #tpu.pipeline_mode<synchronous>, transform_indices = @transform_4, window_bounds = array<i64: 1, 128>}, {transform_indices = @transform_5, window_bounds = array<i64: 16, 128>}]} {
    %c0 = arith.constant 0 : index
    %c0_0 = arith.constant 0 : index
    %0 = vector.load %arg1[%c0, %c0_0] : memref<16x128xbf16, #tpu.memory_space<vmem>>, vector<16x128xbf16>
    %1 = arith.extf %0 : vector<16x128xbf16> to vector<16x128xf32>
    %c0_1 = arith.constant 0 : index
    %c0_2 = arith.constant 0 : index
    %2 = vector.load %arg2[%c0_1, %c0_2] : memref<128x128xbf16, #tpu.memory_space<vmem>>, vector<128x128xbf16>
    %cst = arith.constant dense<0.000000e+00> : vector<16x128xf32>
    %3 = tpu.matmul %0, %2, %cst {dimension_numbers = #tpu.dot_dimension_numbers<[1], [0], [0], [1], [0, 0, 1, 1], [], []>} : vector<16x128xbf16>, vector<128x128xbf16>, vector<16x128xf32> -> vector<16x128xf32>
    %c0_3 = arith.constant 0 : index
    %c0_4 = arith.constant 0 : index
    %4 = vector.load %arg3[%c0_3, %c0_4] : memref<1x128xf32, #tpu.memory_space<vmem>>, vector<1x128xf32>
    %5 = vector.broadcast %4 : vector<1x128xf32> to vector<16x128xf32>
    %6 = arith.addf %3, %5 : vector<16x128xf32>
    %cst_5 = arith.constant 0.000000e+00 : f32
    %7 = vector.broadcast %cst_5 : f32 to vector<16x128xf32>
    %8 = arith.maximumf %6, %7 : vector<16x128xf32>
    %9 = arith.truncf %8 : vector<16x128xf32> to vector<16x128xbf16>
    %c0_6 = arith.constant 0 : index
    %c0_7 = arith.constant 0 : index
    %10 = vector.load %arg4[%c0_6, %c0_7] : memref<128x128xbf16, #tpu.memory_space<vmem>>, vector<128x128xbf16>
    %cst_8 = arith.constant dense<0.000000e+00> : vector<16x128xf32>
    %11 = tpu.matmul %9, %10, %cst_8 {dimension_numbers = #tpu.dot_dimension_numbers<[1], [0], [0], [1], [0, 0, 1, 1], [], []>} : vector<16x128xbf16>, vector<128x128xbf16>, vector<16x128xf32> -> vector<16x128xf32>
    %c0_9 = arith.constant 0 : index
    %c0_10 = arith.constant 0 : index
    %12 = vector.load %arg5[%c0_9, %c0_10] : memref<1x128xf32, #tpu.memory_space<vmem>>, vector<1x128xf32>
    %13 = vector.broadcast %12 : vector<1x128xf32> to vector<16x128xf32>
    %14 = arith.addf %11, %13 : vector<16x128xf32>
    %15 = arith.addf %1, %14 : vector<16x128xf32>
    %cst_11 = arith.constant 0.000000e+00 : f32
    %16 = vector.broadcast %cst_11 : f32 to vector<16x128xf32>
    %17 = arith.maximumf %15, %16 : vector<16x128xf32>
    %c0_12 = arith.constant 0 : index
    %c0_13 = arith.constant 0 : index
    %18 = vector.load %arg6[%c0_12, %c0_13] : memref<16x128xf32, #tpu.memory_space<vmem>>, vector<16x128xf32>
    tpu.vector_store %arg6[%c0_12, %c0_13], %17 {strides = array<i32>} : memref<16x128xf32, #tpu.memory_space<vmem>>, vector<16x128xf32>,
    return
  }
  func.func @transform_0(%arg0: i32) -> (i32, i32) {
    %c0_i32 = arith.constant 0 : i32
    %c0_i32_0 = arith.constant 0 : i32
    return %arg0, %c0_i32 : i32, i32
  }
  func.func @transform_1(%arg0: i32) -> (i32, i32) {
    %c0_i32 = arith.constant 0 : i32
    %c0_i32_0 = arith.constant 0 : i32
    %c0_i32_1 = arith.constant 0 : i32
    return %c0_i32, %c0_i32_0 : i32, i32
  }
  func.func @transform_2(%arg0: i32) -> (i32, i32) {
    %c0_i32 = arith.constant 0 : i32
    %c0_i32_0 = arith.constant 0 : i32
    %c0_i32_1 = arith.constant 0 : i32
    return %c0_i32, %c0_i32_0 : i32, i32
  }
  func.func @transform_3(%arg0: i32) -> (i32, i32) {
    %c0_i32 = arith.constant 0 : i32
    %c0_i32_0 = arith.constant 0 : i32
    %c0_i32_1 = arith.constant 0 : i32
    return %c0_i32, %c0_i32_0 : i32, i32
  }
  func.func @transform_4(%arg0: i32) -> (i32, i32) {
    %c0_i32 = arith.constant 0 : i32
    %c0_i32_0 = arith.constant 0 : i32
    %c0_i32_1 = arith.constant 0 : i32
    return %c0_i32, %c0_i32_0 : i32, i32
  }
  func.func @transform_5(%arg0: i32) -> (i32, i32) {
    %c0_i32 = arith.constant 0 : i32
    %c0_i32_0 = arith.constant 0 : i32
    return %arg0, %c0_i32 : i32, i32
  }
}

</mosaic_0001>

<bundles_post_ra>
// kernel: residual_block.1
= control target key start
LH: loop header
LB: loop body
LE: loop exit
PB: predicated region body
PF: predicated region fallthrough
CT: control target
= control target key end

     0   :  { %10 = vsyncpa [#allocation3], 0  ;;  %s538_s0 = inlined_call_operand.vmem [shape: bf16[16,128], index: 0, kind: input, shape index: {}]   ;;  %s539_s1 = inlined_call_operand.hbm [shape: bf16[128,128], index: 1, kind: input, shape index: {}]   ;;  %s540_s2 = inlined_call_operand.vmem [shape: f32[1,128], index: 2, kind: input, shape index: {}]   ;;  %s541_s3 = inlined_call_operand.hbm [shape: bf16[128,128], index: 3, kind: input, shape index: {}]   ;;  %s542_s4 = inlined_call_operand.vmem [shape: f32[1,128], index: 4, kind: input, shape index: {}]   ;;  %s543_s5 = inlined_call_operand.hbm [shape: f32[16,128], index: 5, kind: output, shape index: {}]  }
   0x1   :  { %11 = vsyncpa [#allocation6], 0 }
   0x2   :  { %12 = vsyncpa [#allocation4], 0  ;;  %s481_s18 = smov [#allocation2]  }
   0x3   :  { %s20_s19 = sshll.u32 %s481_s18, 4  ;;  %s21_s19 = int_to_ptr.vmem [resolvable:$true] %s20_s19 }
   0x4   :  { %s423_s20 = scalar_lea.vmem %s21_s19, 1024  ;;  %p428_p1 = scmp.lt.s32.totalorder %s21_s19, %s21_s19 }
   0x5   :  { %p424_p0 = scmp.ne.s32.totalorder %s21_s19, %s423_s20  ;;  %p429_p2 = scmp.lt.s32.totalorder %s423_s20, %s423_s20 }
   0x7   :  { %p430_p3 = por %p429_p2, %p428_p1 }
   0x9   :  { %p431_p4 = pnand %p430_p3, %p424_p0 }
   0xb   :  { %434 = shalt.err (!%p431_p4)
}
   0xc   :  { %s482_s21 = smov 64   ;;  %s483_s22 = smov 4  }
   0xd   :  { %26 = dma.hbm_to_vmem [thread:$0]  %s539_s1, 1024, %s21_s19, [#allocation3], %s482_s21, %s482_s21, %s483_s22  }
   0xe   :  { %s484_s25 = smov [#allocation5]  }
   0xf   :  { %s34_s26 = sshll.u32 %s484_s25, 4  ;;  %s35_s26 = int_to_ptr.vmem [resolvable:$true] %s34_s26 }
  0x10   :  { %s443_s27 = scalar_lea.vmem %s35_s26, 1024  ;;  %p448_p6 = scmp.lt.s32.totalorder %s35_s26, %s35_s26 }
  0x11   :  { %p444_p5 = scmp.ne.s32.totalorder %s35_s26, %s443_s27  ;;  %p449_p7 = scmp.lt.s32.totalorder %s443_s27, %s443_s27 }
  0x13   :  { %p450_p8 = por %p449_p7, %p448_p6 }
  0x15   :  { %p451_p9 = pnand %p450_p8, %p444_p5 }
  0x17   :  { %454 = shalt.err (!%p451_p9)
}
  0x18   :  { %40 = dma.hbm_to_vmem [thread:$0]  %s541_s3, 1024, %s35_s26, [#allocation6], %s482_s21, %s482_s21, %s483_s22  }
  0x19   :  { %475 = dma.done.wait [#allocation3], 1024  }
  0x1a   :  { %476 = vsyncadd [#allocation3], 4294966272 }
  0x1b   :  { %477 = dma.done.wait [#allocation6], 1024  }
  0x1c   :  { %478 = vsyncadd [#allocation6], 4294966272  ;;  %v485_v0 = vmov 0.0   ;;  %vm486_vm0 = vmmov 0   ;;  %v397_v1 = vld [vmem:[#allocation2 + $0x38] sm:$0xff]   ;;  %v398_v2 = vld [vmem:[#allocation2 + $0x30] sm:$0xff]  }
  0x1d   :  { %348 = vmatprep.subr.bf16.mxu0 %v485_v0  ;;  %364 = vmatprep.mubr.msk.bf16.mxu0 %vm486_vm0, %v485_v0  ;;  %v399_v3 = vld [vmem:[#allocation2 + $0x28] sm:$0xff]   ;;  %v406_v4 = vld [vmem:[#allocation5 + $0x38] sm:$0xff]   ;;  %v400_v5 = vld [vmem:[#allocation2 + $0x20] sm:$0xff]  }
  0x1e   :  { %368 = vmatprep.subr.bf16.mxu1 %v485_v0  ;;  %384 = vmatprep.mubr.msk.bf16.mxu1 %vm486_vm0, %v485_v0  ;;  %v407_v6 = vld [vmem:[#allocation5 + $0x30] sm:$0xff]   ;;  %v401_v7 = vld [vmem:[#allocation2 + $0x18] sm:$0xff]   ;;  %v408_v8 = vld [vmem:[#allocation5 + $0x28] sm:$0xff]  }
  0x1f   :  { %349 = vmatpush3.bf16.msra.mxu0 %v397_v1  ;;  %369 = vmatpush3.bf16.msra.mxu1 %v406_v4  ;;  %v402_v9 = vld [vmem:[#allocation2 + $0x10] sm:$0xff]   ;;  %v409_v10 = vld [vmem:[#allocation5 + $0x20] sm:$0xff]   ;;  %v403_v11 = vld [vmem:[#allocation2 + $0x8] sm:$0xff]  }
  0x20   :  { %350 = vmatprep.subr.bf16.mxu0 %v485_v0  ;;  %370 = vmatprep.subr.bf16.mxu1 %v485_v0  ;;  %v410_v12 = vld [vmem:[#allocation5 + $0x18] sm:$0xff]   ;;  %v404_v13 = vld [vmem:[#allocation2] sm:$0xff]   ;;  %v411_v15 = vld [vmem:[#allocation5 + $0x10] sm:$0xff]  }
  0x21   :  { %v50_v14 = vld [vmem:[%s538_s0] sm:$0xff]   ;;  %v412_v16 = vld [vmem:[#allocation5 + $0x8] sm:$0xff]  }
  0x22   :  { %v413_v17 = vld [vmem:[#allocation5] sm:$0xff]   ;;  %v52_v29 = vunpack.c.l.bf16 %v50_v14  ;;  %v53_v34 = vunpack.c.h.bf16 %v50_v14 }
  0x23   :  { %351 = vmatpush3.bf16.msra.mxu0 %v398_v2  ;;  %371 = vmatpush3.bf16.msra.mxu1 %v407_v6  ;;  %v311_v18 = vld [vmem:[%s540_s2] ss:$0 sm:$0xff]  ;;  %s487_s2 = smov [#allocation7]  }
  0x24   :  { %352 = vmatprep.subr.bf16.mxu0 %v485_v0  ;;  %372 = vmatprep.subr.bf16.mxu1 %v485_v0  ;;  %v321_v28 = vld [vmem:[%s542_s4] ss:$0 sm:$0xff]  ;;  %s298_s8 = sshll.u32 %s487_s2, 4  ;;  %s299_s8 = int_to_ptr.vmem [resolvable:$true] %s298_s8 }
  0x25   :  { %s455_s9 = scalar_lea.vmem %s299_s8, 256  ;;  %p460_p11 = scmp.lt.s32.totalorder %s299_s8, %s299_s8 }
  0x26   :  { %p456_p10 = scmp.ne.s32.totalorder %s299_s8, %s455_s9  ;;  %p461_p12 = scmp.lt.s32.totalorder %s455_s9, %s455_s9 }
  0x27   :  { %353 = vmatpush3.bf16.msra.mxu0 %v399_v3  ;;  %373 = vmatpush3.bf16.msra.mxu1 %v408_v8 }
  0x28   :  { %354 = vmatprep.subr.bf16.mxu0 %v485_v0  ;;  %374 = vmatprep.subr.bf16.mxu1 %v485_v0  ;;  %p462_p13 = por %p461_p12, %p460_p11 }
  0x2a   :  { %p463_p0 = pnand %p462_p13, %p456_p10 }
  0x2b   :  { %355 = vmatpush3.bf16.msra.mxu0 %v400_v5  ;;  %375 = vmatpush3.bf16.msra.mxu1 %v409_v10 }
  0x2c   :  { %356 = vmatprep.subr.bf16.mxu0 %v485_v0  ;;  %376 = vmatprep.subr.bf16.mxu1 %v485_v0 }
  0x2f   :  { %357 = vmatpush3.bf16.msra.mxu0 %v401_v7  ;;  %377 = vmatpush3.bf16.msra.mxu1 %v410_v12 }
  0x30   :  { %358 = vmatprep.subr.bf16.mxu0 %v485_v0  ;;  %378 = vmatprep.subr.bf16.mxu1 %v485_v0 }
  0x33   :  { %359 = vmatpush3.bf16.msra.mxu0 %v402_v9  ;;  %379 = vmatpush3.bf16.msra.mxu1 %v411_v15 }
  0x34   :  { %360 = vmatprep.subr.bf16.mxu0 %v485_v0  ;;  %380 = vmatprep.subr.bf16.mxu1 %v485_v0 }
  0x37   :  { %361 = vmatpush3.bf16.msra.mxu0 %v403_v11  ;;  %381 = vmatpush3.bf16.msra.mxu1 %v412_v16 }
  0x38   :  { %362 = vmatprep.subr.bf16.mxu0 %v485_v0  ;;  %382 = vmatprep.subr.bf16.mxu1 %v485_v0 }
  0x3b   :  { %363 = vmatpush3.bf16.msra.mxu0 %v404_v13  ;;  %383 = vmatpush3.bf16.msra.mxu1 %v413_v17 }
  0x3e   :  { %365 = vmatmul.mubr.bf16.vlgmr.msra.gmra.mxu0 %v50_v14 }
  0xfe   :  { %v165_v19 = vpop.f32.mrf.mxu0 }
  0xff   :  { %v166_v21 = vadd.f32 %v311_v18, %v165_v19 }
 0x100   :  { %v366_v20 = vpop.f32.mrf.mxu0 }
 0x101   :  { %v172_v25 = vmax.f32 %v166_v21, 0.0 }
 0x102   :  { %v168_v22 = vpop.f32.mrf.mxu0 }
 0x103   :  { %v169_v23 = vadd.f32 %v311_v18, %v168_v22 }
 0x104   :  { %v367_v24 = vpop.f32.mrf.mxu0 }
 0x105   :  { %v173_v26 = vmax.f32 %v169_v23, 0.0 }
 0x107   :  { %v174_v27 = vpack.c.bf16 %v173_v26, %v172_v25 }
 0x109   :  { %385 = vmatmul.mubr.bf16.vlgmr.msra.gmra.mxu1 %v174_v27 }
 0x1c9   :  { %v280_v30 = vpop.f32.mrf.mxu1 }
 0x1ca   :  { %v281_v31 = vadd.f32 %v321_v28, %v280_v30 }
 0x1cb   :  { %v386_v32 = vpop.f32.mrf.mxu1 }
 0x1cc   :  { %v287_v33 = vadd.f32 %v281_v31, %v52_v29 }
 0x1cd   :  { %v283_v35 = vpop.f32.mrf.mxu1 }
 0x1ce   :  { %v289_v36 = vmax.f32 %v287_v33, 0.0  ;;  %v284_v37 = vadd.f32 %v321_v28, %v283_v35 }
 0x1cf   :  { %v387_v38 = vpop.f32.mrf.mxu1 }
 0x1d0   :  { %291 = vst [vmem:[#allocation7] sm:$0xff] %v289_v36  ;;  %v288_v39 = vadd.f32 %v284_v37, %v53_v34 }
 0x1d2   :  { %v290_v40 = vmax.f32 %v288_v39, 0.0 }
 0x1d4   :  { %292 = vst [vmem:[#allocation7 + $0x8] sm:$0xff] %v290_v40 }
 0x1d5   :  { %466 = shalt.err (!%p463_p0)
}
 0x1d6   :  { %s488_s4 = smov 128   ;;  %s489_s10 = smov 8  }
 0x1d7   :  { %304 = dma.vmem_to_hbm [thread:$0]  %s299_s8, 256, %s543_s5, [#allocation4], %s488_s4, %s488_s4, %s489_s10  }
 0x1d8   :  { %479 = dma.done.wait [#allocation4], 256  }
 0x1d9   :  { %480 = vsyncadd [#allocation4], 4294967040 }
 0x1da   :  { %308 = vsyncpa [#allocation3], 1 }
 0x1db   :  { %309 = vsyncpa [#allocation6], 1 }
 0x1dc   :  { %310 = vsyncpa [#allocation4], 1 }

</bundles_post_ra>
